<compile_context>
chip_gen: v7x
topology: tpu7x:2x2x1
jax: 0.10.0
libtpu: 0.0.40
codegen_flags: <defaults>
</compile_context>

<pallas_src>
from functools import partial

import jax
import jax.numpy as jnp
from jax.experimental import pallas as pl
from jax.experimental.pallas import tpu as pltpu


def fusion_kernel(f1_ref, f2_ref, mask_ref, w1_ref, w2_ref,
                  wfa_ref, wfb_ref, wc_ref, bias_ref, out_ref,
                  *, N, H, W):
    HW = H * W
    NHW = N * HW

    b1 = bias_ref[:, 0:1]
    b2 = bias_ref[:, 1:2]
    bf = bias_ref[:, 2:3]
    bc = bias_ref[:, 3:4]

    # 1x1 ConvBnReLU (BN scale already folded into the bf16 weights).
    x1 = f1_ref[...].astype(jnp.bfloat16)
    x2 = f2_ref[...].astype(jnp.bfloat16)
    p1 = jnp.maximum(
        jnp.dot(w1_ref[...], x1, preferred_element_type=jnp.float32) + b1, 0.0)
    p2 = jnp.maximum(
        jnp.dot(w2_ref[...], x2, preferred_element_type=jnp.float32) + b2, 0.0)

    # Fusion 1x1 ConvBnReLU on cat(p1, p2): weight split into two bf16 dots
    # summed in f32 (identical math, zero data movement for the concat).
    u = (jnp.dot(wfa_ref[...], p1.astype(jnp.bfloat16),
                 preferred_element_type=jnp.float32)
         + jnp.dot(wfb_ref[...], p2.astype(jnp.bfloat16),
                   preferred_element_type=jnp.float32))
    u = jnp.maximum(u + bf, 0.0)                               # (Cm, NHW) f32

    # 3x3 conv, padding=1: 9 lane-rolled taps of u, zeroed at row/col/image
    # boundaries by the host-built mask, stacked on the sublane axis and
    # contracted in one bf16 MXU matmul (K = 9*Cm).
    taps = []
    for dy in range(3):
        for dx in range(3):
            t = dy * 3 + dx
            shift = (dy - 1) * W + (dx - 1)
            v = u if shift == 0 else pltpu.roll(u, shift=(-shift) % NHW, axis=1)
            if not (dy == 1 and dx == 1):
                v = v * mask_ref[t:t + 1]                      # f32 mul (v5e-safe)
            taps.append(v)
    stack = jnp.concatenate(taps, axis=0).astype(jnp.bfloat16)  # (9*Cm, NHW)
    acc = jnp.dot(wc_ref[...], stack, preferred_element_type=jnp.float32) + bc

    sig = jax.nn.sigmoid(acc)                                   # (Cm, NHW) f32

    # GlobalAvgPool2d per image + mix; static lane-aligned slices (HW % 128 == 0).
    for n in range(N):
        lo, hi = n * HW, (n + 1) * HW
        wn = jnp.mean(sig[:, lo:hi], axis=1, keepdims=True)     # (Cm, 1)
        out_ref[:, lo:hi] = ((1.0 - wn) * p1[:, lo:hi]
                             + wn * p2[:, lo:hi]).astype(out_ref.dtype)


def make_tap_masks(N, H, W):
    """(9, N*H*W) f32 validity masks for the 9 taps of a padding=1 3x3 conv on
    images laid out contiguously along the lane axis.  Zeroes both the
    zero-padding positions and the cross-image wraps of the lane rolls."""
    HW = H * W
    pix = jnp.arange(N * HW, dtype=jnp.int32)
    q = pix % HW
    row, col = q // W, q % W
    ones = jnp.ones_like(row, dtype=bool)
    rows_ok = [row >= 1, ones, row <= H - 2]
    cols_ok = [col >= 1, ones, col <= W - 2]
    masks = [jnp.logical_and(rows_ok[dy], cols_ok[dx])
             for dy in range(3) for dx in range(3)]
    return jnp.stack(masks, axis=0).astype(jnp.float32)


def fold_params(params):
    """Fold BN scales into the conv weights (cast bf16) and pack the biases."""
    Cm = params["w1t"].shape[0]
    w1 = (params["w1t"] * params["s1"]).astype(jnp.bfloat16)    # (Cm, C1)
    w2 = (params["w2t"] * params["s2"]).astype(jnp.bfloat16)    # (Cm, C2)
    wfa = (params["wfat"] * params["sf"]).astype(jnp.bfloat16)  # (Cm, Cm)
    wfb = (params["wfbt"] * params["sf"]).astype(jnp.bfloat16)  # (Cm, Cm)
    # (kh, kw, Cin, Cout) -> (Cout, 9*Cin), tap-major (dy, dx), matching the
    # in-kernel tap stacking order.
    wc = jnp.transpose(params["wc"], (3, 0, 1, 2)).reshape(Cm, 9 * Cm)
    wc = wc.astype(jnp.bfloat16)
    biases = jnp.concatenate(
        [params["b1"], params["b2"], params["bf"], params["bc"]],
        axis=1).astype(jnp.float32)                             # (Cm, 4)
    return dict(w1=w1, w2=w2, wfa=wfa, wfb=wfb, wc=wc, biases=biases)


def fusion_block(f1_nchw, f2_nchw, params):
    N, C1, H, W = f1_nchw.shape
    C2 = f2_nchw.shape[1]
    Cm = params["w1t"].shape[0]
    HW = H * W
    NHW = N * HW
    assert HW % 128 == 0, "spatial extent must be lane-aligned"

    # Channels-major lane-dense slabs with the batch folded into the lane axis.
    f1 = jnp.transpose(f1_nchw, (1, 0, 2, 3)).reshape(C1, NHW)   # f32
    f2 = jnp.transpose(f2_nchw, (1, 0, 2, 3)).reshape(C2, NHW)   # f32

    prep = fold_params(params)
    mask = make_tap_masks(N, H, W)                               # (9, NHW) f32

    inputs = [f1, f2, mask, prep["w1"], prep["w2"], prep["wfa"], prep["wfb"],
              prep["wc"], prep["biases"]]

    def full_spec(a):
        nd = a.ndim
        return pl.BlockSpec(a.shape, lambda i, _nd=nd: (0,) * _nd)

    grid_spec = pltpu.PrefetchScalarGridSpec(
        num_scalar_prefetch=0,
        grid=(1,),
        in_specs=[full_spec(a) for a in inputs],
        out_specs=pl.BlockSpec((Cm, NHW), lambda i: (0, 0)),
    )

    # Output stays f32 to match the PyTorch module; switch out_shape dtype to
    # bfloat16 if the downstream consumer accepts it (halves writeback bytes).
    out = pl.pallas_call(
        partial(fusion_kernel, N=N, H=H, W=W),
        out_shape=jax.ShapeDtypeStruct((Cm, NHW), jnp.float32),
        grid_spec=grid_spec,
        compiler_params=pltpu.CompilerParams(
            dimension_semantics=("arbitrary",)),
    )(*inputs)
    return jnp.transpose(out.reshape(Cm, N, H, W), (1, 0, 2, 3))


def init_params(key, in_ch1, in_ch2, mid_ch):
    ks = jax.random.split(key, 5)

    def kaiming_t(k, cout, cin):
        # kaiming_normal_(mode='fan_out') for a 1x1 conv, stored as (Cout, Cin).
        return jax.random.normal(k, (cout, cin), jnp.float32) * (2.0 / cout) ** 0.5

    eps = 1e-5
    gamma, beta, rmean, rvar = 1.0, 0.0, 0.0, 1.0               # module init / defaults
    scale = gamma / (rvar + eps) ** 0.5
    bias = beta - rmean * scale

    def bn_vec(c):
        return (jnp.full((c, 1), scale, jnp.float32),
                jnp.full((c, 1), bias, jnp.float32))

    w1t = kaiming_t(ks[0], mid_ch, in_ch1)
    w2t = kaiming_t(ks[1], mid_ch, in_ch2)
    wft = kaiming_t(ks[2], mid_ch, 2 * mid_ch)                  # fusion 1x1, (Cm, 2Cm)
    wfat, wfbt = wft[:, :mid_ch], wft[:, mid_ch:]
    wc = jax.random.normal(ks[3], (3, 3, mid_ch, mid_ch),
                           jnp.float32) * (2.0 / (mid_ch * 9)) ** 0.5
    bound = 1.0 / (mid_ch * 9) ** 0.5                           # Conv2d default bias init
    bc = jax.random.uniform(ks[4], (mid_ch, 1), jnp.float32, -bound, bound)

    s1, b1 = bn_vec(mid_ch)
    s2, b2 = bn_vec(mid_ch)
    sf, bf = bn_vec(mid_ch)
    return dict(w1t=w1t, s1=s1, b1=b1, w2t=w2t, s2=s2, b2=b2,
                wfat=wfat, wfbt=wfbt, sf=sf, bf=bf, wc=wc, bc=bc)


def reference(f1_nchw, f2_nchw, params):
    """Pure-JAX NCHW reference mirroring the kernel's bf16 dot operands."""
    N, C1, H, W = f1_nchw.shape
    C2 = f2_nchw.shape[1]
    Cm = params["w1t"].shape[0]
    HW = H * W
    prep = fold_params(params)

    f1 = f1_nchw.reshape(N, C1, HW).astype(jnp.bfloat16)
    f2 = f2_nchw.reshape(N, C2, HW).astype(jnp.bfloat16)

    def dot_bf(wT, x):
        return jnp.einsum("oc,ncp->nop", wT, x,
                          preferred_element_type=jnp.float32)

    p1 = jnp.maximum(dot_bf(prep["w1"], f1) + params["b1"], 0.0)
    p2 = jnp.maximum(dot_bf(prep["w2"], f2) + params["b2"], 0.0)
    u = (dot_bf(prep["wfa"], p1.astype(jnp.bfloat16))
         + dot_bf(prep["wfb"], p2.astype(jnp.bfloat16)))
    u = jnp.maximum(u + params["bf"], 0.0).reshape(N, Cm, H, W)

    wc_b = params["wc"].astype(jnp.bfloat16)                    # (3, 3, Cm, Cm)
    up = jnp.pad(u.astype(jnp.bfloat16), ((0, 0), (0, 0), (1, 1), (1, 1)))
    acc = jnp.zeros((N, Cm, H, W), jnp.float32) + params["bc"].reshape(1, Cm, 1, 1)
    for dy in range(3):
        for dx in range(3):
            acc = acc + jnp.einsum("co,nchw->nohw", wc_b[dy, dx],
                                   up[:, :, dy:dy + H, dx:dx + W],
                                   preferred_element_type=jnp.float32)
    sig = jax.nn.sigmoid(acc).reshape(N, Cm, HW)
    wgt = jnp.mean(sig, axis=2, keepdims=True)                  # (N, Cm, 1)
    m = (1.0 - wgt) * p1 + wgt * p2
    return m.reshape(N, Cm, H, W)


if __name__ == "__main__":
    key = jax.random.PRNGKey(0)
    N, H, W = 2, 16, 16
    in_ch1, in_ch2, mid_ch = 4, 8, 8          # in_ch1 != in_ch2 -> projection path

    k1, k2, kp = jax.random.split(key, 3)
    f1 = jax.random.normal(k1, (N, in_ch1, H, W), jnp.float32)
    f2 = jax.random.normal(k2, (N, in_ch2, H, W), jnp.float32)
    params = init_params(kp, in_ch1, in_ch2, mid_ch)

    out = jax.block_until_ready(fusion_block(f1, f2, params))

    ref = reference(f1, f2, params)
    err = float(jnp.max(jnp.abs(out - ref)))
    assert jnp.allclose(out, ref, atol=2e-2, rtol=2e-2), err
    print("KERNEL_OK")
</pallas_src>

<mosaic_0001>
module attributes {stable_mosaic.version = 11 : i64} {
  func.func @fusion_kernel(%arg0: i32, %arg1: memref<4x512xf32, #tpu.memory_space<vmem>>, %arg2: memref<8x512xf32, #tpu.memory_space<vmem>>, %arg3: memref<9x512xf32, #tpu.memory_space<vmem>>, %arg4: memref<8x4xbf16, #tpu.memory_space<vmem>>, %arg5: memref<8x8xbf16, #tpu.memory_space<vmem>>, %arg6: memref<8x8xbf16, #tpu.memory_space<vmem>>, %arg7: memref<8x8xbf16, #tpu.memory_space<vmem>>, %arg8: memref<8x72xbf16, #tpu.memory_space<vmem>>, %arg9: memref<8x4xf32, #tpu.memory_space<vmem>>, %arg10: memref<8x512xf32, #tpu.memory_space<vmem>>) attributes {dimension_semantics = [#tpu.dimension_semantics<arbitrary>], iteration_bounds = array<i64: 1>, scalar_prefetch = 0 : i64, scratch_operands = 0 : i64, tpu.core_type = #tpu.core_type<tc>, window_params = [{pipeline_mode = #tpu.pipeline_mode<synchronous>, transform_indices = @transform_0, window_bounds = array<i64: 4, 512>}, {pipeline_mode = #tpu.pipeline_mode<synchronous>, transform_indices = @transform_1, window_bounds = array<i64: 8, 512>}, {pipeline_mode = #tpu.pipeline_mode<synchronous>, transform_indices = @transform_2, window_bounds = array<i64: 9, 512>}, {pipeline_mode = #tpu.pipeline_mode<synchronous>, transform_indices = @transform_3, window_bounds = array<i64: 8, 4>}, {pipeline_mode = #tpu.pipeline_mode<synchronous>, transform_indices = @transform_4, window_bounds = array<i64: 8, 8>}, {pipeline_mode = #tpu.pipeline_mode<synchronous>, transform_indices = @transform_5, window_bounds = array<i64: 8, 8>}, {pipeline_mode = #tpu.pipeline_mode<synchronous>, transform_indices = @transform_6, window_bounds = array<i64: 8, 8>}, {pipeline_mode = #tpu.pipeline_mode<synchronous>, transform_indices = @transform_7, window_bounds = array<i64: 8, 72>}, {pipeline_mode = #tpu.pipeline_mode<synchronous>, transform_indices = @transform_8, window_bounds = array<i64: 8, 4>}, {pipeline_mode = #tpu.pipeline_mode<synchronous>, transform_indices = @transform_9, window_bounds = array<i64: 8, 512>}]} {
    %c0 = arith.constant 0 : index
    %c0_0 = arith.constant 0 : index
    %0 = vector.load %arg9[%c0, %c0_0] : memref<8x4xf32, #tpu.memory_space<vmem>>, vector<8x1xf32>
    %c0_1 = arith.constant 0 : index
    %c1 = arith.constant 1 : index
    %1 = vector.load %arg9[%c0_1, %c1] : memref<8x4xf32, #tpu.memory_space<vmem>>, vector<8x1xf32>
    %c0_2 = arith.constant 0 : index
    %c2 = arith.constant 2 : index
    %2 = vector.load %arg9[%c0_2, %c2] : memref<8x4xf32, #tpu.memory_space<vmem>>, vector<8x1xf32>
    %c0_3 = arith.constant 0 : index
    %c3 = arith.constant 3 : index
    %3 = vector.load %arg9[%c0_3, %c3] : memref<8x4xf32, #tpu.memory_space<vmem>>, vector<8x1xf32>
    %c0_4 = arith.constant 0 : index
    %c0_5 = arith.constant 0 : index
    %4 = vector.load %arg1[%c0_4, %c0_5] : memref<4x512xf32, #tpu.memory_space<vmem>>, vector<4x512xf32>
    %5 = arith.truncf %4 : vector<4x512xf32> to vector<4x512xbf16>
    %c0_6 = arith.constant 0 : index
    %c0_7 = arith.constant 0 : index
    %6 = vector.load %arg2[%c0_6, %c0_7] : memref<8x512xf32, #tpu.memory_space<vmem>>, vector<8x512xf32>
    %7 = arith.truncf %6 : vector<8x512xf32> to vector<8x512xbf16>
    %c0_8 = arith.constant 0 : index
    %c0_9 = arith.constant 0 : index
    %8 = vector.load %arg4[%c0_8, %c0_9] : memref<8x4xbf16, #tpu.memory_space<vmem>>, vector<8x4xbf16>
    %cst = arith.constant dense<0.000000e+00> : vector<8x512xf32>
    %9 = tpu.matmul %8, %5, %cst {dimension_numbers = #tpu.dot_dimension_numbers<[1], [0], [0], [1], [0, 0, 1, 1], [], []>} : vector<8x4xbf16>, vector<4x512xbf16>, vector<8x512xf32> -> vector<8x512xf32>
    %10 = vector.broadcast %0 : vector<8x1xf32> to vector<8x512xf32>
    %11 = arith.addf %9, %10 : vector<8x512xf32>
    %cst_10 = arith.constant 0.000000e+00 : f32
    %12 = vector.broadcast %cst_10 : f32 to vector<8x512xf32>
    %13 = arith.maximumf %11, %12 : vector<8x512xf32>
    %c0_11 = arith.constant 0 : index
    %c0_12 = arith.constant 0 : index
    %14 = vector.load %arg5[%c0_11, %c0_12] : memref<8x8xbf16, #tpu.memory_space<vmem>>, vector<8x8xbf16>
    %cst_13 = arith.constant dense<0.000000e+00> : vector<8x512xf32>
    %15 = tpu.matmul %14, %7, %cst_13 {dimension_numbers = #tpu.dot_dimension_numbers<[1], [0], [0], [1], [0, 0, 1, 1], [], []>} : vector<8x8xbf16>, vector<8x512xbf16>, vector<8x512xf32> -> vector<8x512xf32>
    %16 = vector.broadcast %1 : vector<8x1xf32> to vector<8x512xf32>
    %17 = arith.addf %15, %16 : vector<8x512xf32>
    %cst_14 = arith.constant 0.000000e+00 : f32
    %18 = vector.broadcast %cst_14 : f32 to vector<8x512xf32>
    %19 = arith.maximumf %17, %18 : vector<8x512xf32>
    %c0_15 = arith.constant 0 : index
    %c0_16 = arith.constant 0 : index
    %20 = vector.load %arg6[%c0_15, %c0_16] : memref<8x8xbf16, #tpu.memory_space<vmem>>, vector<8x8xbf16>
    %21 = arith.truncf %13 : vector<8x512xf32> to vector<8x512xbf16>
    %cst_17 = arith.constant dense<0.000000e+00> : vector<8x512xf32>
    %22 = tpu.matmul %20, %21, %cst_17 {dimension_numbers = #tpu.dot_dimension_numbers<[1], [0], [0], [1], [0, 0, 1, 1], [], []>} : vector<8x8xbf16>, vector<8x512xbf16>, vector<8x512xf32> -> vector<8x512xf32>
    %c0_18 = arith.constant 0 : index
    %c0_19 = arith.constant 0 : index
    %23 = vector.load %arg7[%c0_18, %c0_19] : memref<8x8xbf16, #tpu.memory_space<vmem>>, vector<8x8xbf16>
    %24 = arith.truncf %19 : vector<8x512xf32> to vector<8x512xbf16>
    %cst_20 = arith.constant dense<0.000000e+00> : vector<8x512xf32>
    %25 = tpu.matmul %23, %24, %cst_20 {dimension_numbers = #tpu.dot_dimension_numbers<[1], [0], [0], [1], [0, 0, 1, 1], [], []>} : vector<8x8xbf16>, vector<8x512xbf16>, vector<8x512xf32> -> vector<8x512xf32>
    %26 = arith.addf %22, %25 : vector<8x512xf32>
    %27 = vector.broadcast %2 : vector<8x1xf32> to vector<8x512xf32>
    %28 = arith.addf %26, %27 : vector<8x512xf32>
    %cst_21 = arith.constant 0.000000e+00 : f32
    %29 = vector.broadcast %cst_21 : f32 to vector<8x512xf32>
    %30 = arith.maximumf %28, %29 : vector<8x512xf32>
    %c17_i32 = arith.constant 17 : i32
    %31 = tpu.dynamic_rotate %30 by %c17_i32 dim 1 : vector<8x512xf32>, i32 -> vector<8x512xf32>
    %c0_22 = arith.constant 0 : index
    %c0_23 = arith.constant 0 : index
    %32 = vector.load %arg3[%c0_22, %c0_23] : memref<9x512xf32, #tpu.memory_space<vmem>>, vector<1x512xf32>
    %33 = vector.broadcast %32 : vector<1x512xf32> to vector<8x512xf32>
    %34 = arith.mulf %31, %33 : vector<8x512xf32>
    %c16_i32 = arith.constant 16 : i32
    %35 = tpu.dynamic_rotate %30 by %c16_i32 dim 1 : vector<8x512xf32>, i32 -> vector<8x512xf32>
    %c1_24 = arith.constant 1 : index
    %c0_25 = arith.constant 0 : index
    %36 = vector.load %arg3[%c1_24, %c0_25] : memref<9x512xf32, #tpu.memory_space<vmem>>, vector<1x512xf32>
    %37 = vector.broadcast %36 : vector<1x512xf32> to vector<8x512xf32>
    %38 = arith.mulf %35, %37 : vector<8x512xf32>
    %c15_i32 = arith.constant 15 : i32
    %39 = tpu.dynamic_rotate %30 by %c15_i32 dim 1 : vector<8x512xf32>, i32 -> vector<8x512xf32>
    %c2_26 = arith.constant 2 : index
    %c0_27 = arith.constant 0 : index
    %40 = vector.load %arg3[%c2_26, %c0_27] : memref<9x512xf32, #tpu.memory_space<vmem>>, vector<1x512xf32>
    %41 = vector.broadcast %40 : vector<1x512xf32> to vector<8x512xf32>
    %42 = arith.mulf %39, %41 : vector<8x512xf32>
    %c1_i32 = arith.constant 1 : i32
    %43 = tpu.dynamic_rotate %30 by %c1_i32 dim 1 : vector<8x512xf32>, i32 -> vector<8x512xf32>
    %c3_28 = arith.constant 3 : index
    %c0_29 = arith.constant 0 : index
    %44 = vector.load %arg3[%c3_28, %c0_29] : memref<9x512xf32, #tpu.memory_space<vmem>>, vector<1x512xf32>
    %45 = vector.broadcast %44 : vector<1x512xf32> to vector<8x512xf32>
    %46 = arith.mulf %43, %45 : vector<8x512xf32>
    %c511_i32 = arith.constant 511 : i32
    %47 = tpu.dynamic_rotate %30 by %c511_i32 dim 1 : vector<8x512xf32>, i32 -> vector<8x512xf32>
    %c5 = arith.constant 5 : index
    %c0_30 = arith.constant 0 : index
    %48 = vector.load %arg3[%c5, %c0_30] : memref<9x512xf32, #tpu.memory_space<vmem>>, vector<1x512xf32>
    %49 = vector.broadcast %48 : vector<1x512xf32> to vector<8x512xf32>
    %50 = arith.mulf %47, %49 : vector<8x512xf32>
    %c497_i32 = arith.constant 497 : i32
    %51 = tpu.dynamic_rotate %30 by %c497_i32 dim 1 : vector<8x512xf32>, i32 -> vector<8x512xf32>
    %c6 = arith.constant 6 : index
    %c0_31 = arith.constant 0 : index
    %52 = vector.load %arg3[%c6, %c0_31] : memref<9x512xf32, #tpu.memory_space<vmem>>, vector<1x512xf32>
    %53 = vector.broadcast %52 : vector<1x512xf32> to vector<8x512xf32>
    %54 = arith.mulf %51, %53 : vector<8x512xf32>
    %c496_i32 = arith.constant 496 : i32
    %55 = tpu.dynamic_rotate %30 by %c496_i32 dim 1 : vector<8x512xf32>, i32 -> vector<8x512xf32>
    %c7 = arith.constant 7 : index
    %c0_32 = arith.constant 0 : index
    %56 = vector.load %arg3[%c7, %c0_32] : memref<9x512xf32, #tpu.memory_space<vmem>>, vector<1x512xf32>
    %57 = vector.broadcast %56 : vector<1x512xf32> to vector<8x512xf32>
    %58 = arith.mulf %55, %57 : vector<8x512xf32>
    %c495_i32 = arith.constant 495 : i32
    %59 = tpu.dynamic_rotate %30 by %c495_i32 dim 1 : vector<8x512xf32>, i32 -> vector<8x512xf32>
    %c8 = arith.constant 8 : index
    %c0_33 = arith.constant 0 : index
    %60 = vector.load %arg3[%c8, %c0_33] : memref<9x512xf32, #tpu.memory_space<vmem>>, vector<1x512xf32>
    %61 = vector.broadcast %60 : vector<1x512xf32> to vector<8x512xf32>
    %62 = arith.mulf %59, %61 : vector<8x512xf32>
    %63 = tpu.concatenate %34, %38, %42, %46, %30, %50, %54, %58, %62 in 0 : vector<8x512xf32>, vector<8x512xf32>, vector<8x512xf32>, vector<8x512xf32>, vector<8x512xf32>, vector<8x512xf32>, vector<8x512xf32>, vector<8x512xf32>, vector<8x512xf32> -> vector<72x512xf32>
    %64 = arith.truncf %63 : vector<72x512xf32> to vector<72x512xbf16>
    %c0_34 = arith.constant 0 : index
    %c0_35 = arith.constant 0 : index
    %65 = vector.load %arg8[%c0_34, %c0_35] : memref<8x72xbf16, #tpu.memory_space<vmem>>, vector<8x72xbf16>
    %cst_36 = arith.constant dense<0.000000e+00> : vector<8x512xf32>
    %66 = tpu.matmul %65, %64, %cst_36 {dimension_numbers = #tpu.dot_dimension_numbers<[1], [0], [0], [1], [0, 0, 1, 1], [], []>} : vector<8x72xbf16>, vector<72x512xbf16>, vector<8x512xf32> -> vector<8x512xf32>
    %67 = vector.broadcast %3 : vector<8x1xf32> to vector<8x512xf32>
    %68 = arith.addf %66, %67 : vector<8x512xf32>
    %69 = arith.negf %68 : vector<8x512xf32>
    %70 = math.exp %69 : vector<8x512xf32>
    %cst_37 = arith.constant 1.000000e+00 : f32
    %71 = vector.broadcast %cst_37 : f32 to vector<8x512xf32>
    %72 = arith.addf %71, %70 : vector<8x512xf32>
    %73 = arith.divf %71, %72 : vector<8x512xf32>
    %74 = vector.extract_strided_slice %73 {offsets = [0, 0], sizes = [8, 256], strides = [1, 1]} : vector<8x512xf32> to vector<8x256xf32>
    %cst_38 = arith.constant dense<0.000000e+00> : vector<8xf32>
    %75 = vector.multi_reduction <add>, %74, %cst_38 [1] : vector<8x256xf32> to vector<8xf32>
    %76 = vector.shape_cast %75 : vector<8xf32> to vector<8x1xf32>
    %cst_39 = arith.constant 2.560000e+02 : f32
    %77 = vector.broadcast %cst_39 : f32 to vector<8x1xf32>
    %78 = arith.divf %76, %77 : vector<8x1xf32>
    %cst_40 = arith.constant 1.000000e+00 : f32
    %79 = vector.broadcast %cst_40 : f32 to vector<8x1xf32>
    %80 = arith.subf %79, %78 : vector<8x1xf32>
    %81 = vector.extract_strided_slice %13 {offsets = [0, 0], sizes = [8, 256], strides = [1, 1]} : vector<8x512xf32> to vector<8x256xf32>
    %82 = vector.broadcast %80 : vector<8x1xf32> to vector<8x256xf32>
    %83 = arith.mulf %82, %81 : vector<8x256xf32>
    %84 = vector.extract_strided_slice %19 {offsets = [0, 0], sizes = [8, 256], strides = [1, 1]} : vector<8x512xf32> to vector<8x256xf32>
    %85 = vector.broadcast %78 : vector<8x1xf32> to vector<8x256xf32>
    %86 = arith.mulf %85, %84 : vector<8x256xf32>
    %87 = arith.addf %83, %86 : vector<8x256xf32>
    %c0_41 = arith.constant 0 : index
    %c0_42 = arith.constant 0 : index
    %88 = vector.load %arg10[%c0_41, %c0_42] : memref<8x512xf32, #tpu.memory_space<vmem>>, vector<8x256xf32>
    tpu.vector_store %arg10[%c0_41, %c0_42], %87 {strides = array<i32>} : memref<8x512xf32, #tpu.memory_space<vmem>>, vector<8x256xf32>,
    %89 = vector.extract_strided_slice %73 {offsets = [0, 256], sizes = [8, 256], strides = [1, 1]} : vector<8x512xf32> to vector<8x256xf32>
    %cst_43 = arith.constant dense<0.000000e+00> : vector<8xf32>
    %90 = vector.multi_reduction <add>, %89, %cst_43 [1] : vector<8x256xf32> to vector<8xf32>
    %91 = vector.shape_cast %90 : vector<8xf32> to vector<8x1xf32>
    %cst_44 = arith.constant 2.560000e+02 : f32
    %92 = vector.broadcast %cst_44 : f32 to vector<8x1xf32>
    %93 = arith.divf %91, %92 : vector<8x1xf32>
    %cst_45 = arith.constant 1.000000e+00 : f32
    %94 = vector.broadcast %cst_45 : f32 to vector<8x1xf32>
    %95 = arith.subf %94, %93 : vector<8x1xf32>
    %96 = vector.extract_strided_slice %13 {offsets = [0, 256], sizes = [8, 256], strides = [1, 1]} : vector<8x512xf32> to vector<8x256xf32>
    %97 = vector.broadcast %95 : vector<8x1xf32> to vector<8x256xf32>
    %98 = arith.mulf %97, %96 : vector<8x256xf32>
    %99 = vector.extract_strided_slice %19 {offsets = [0, 256], sizes = [8, 256], strides = [1, 1]} : vector<8x512xf32> to vector<8x256xf32>
    %100 = vector.broadcast %93 : vector<8x1xf32> to vector<8x256xf32>
    %101 = arith.mulf %100, %99 : vector<8x256xf32>
    %102 = arith.addf %98, %101 : vector<8x256xf32>
    %c0_46 = arith.constant 0 : index
    %c256 = arith.constant 256 : index
    %103 = vector.load %arg10[%c0_46, %c256] : memref<8x512xf32, #tpu.memory_space<vmem>>, vector<8x256xf32>
    tpu.vector_store %arg10[%c0_46, %c256], %102 {strides = array<i32>} : memref<8x512xf32, #tpu.memory_space<vmem>>, vector<8x256xf32>,
    return
  }
  func.func @transform_0(%arg0: i32) -> (i32, i32) {
    %c0_i32 = arith.constant 0 : i32
    %c0_i32_0 = arith.constant 0 : i32
    %c0_i32_1 = arith.constant 0 : i32
    return %c0_i32, %c0_i32_0 : i32, i32
  }
  func.func @transform_1(%arg0: i32) -> (i32, i32) {
    %c0_i32 = arith.constant 0 : i32
    %c0_i32_0 = arith.constant 0 : i32
    %c0_i32_1 = arith.constant 0 : i32
    return %c0_i32, %c0_i32_0 : i32, i32
  }
  func.func @transform_2(%arg0: i32) -> (i32, i32) {
    %c0_i32 = arith.constant 0 : i32
    %c0_i32_0 = arith.constant 0 : i32
    %c0_i32_1 = arith.constant 0 : i32
    return %c0_i32, %c0_i32_0 : i32, i32
  }
  func.func @transform_3(%arg0: i32) -> (i32, i32) {
    %c0_i32 = arith.constant 0 : i32
    %c0_i32_0 = arith.constant 0 : i32
    %c0_i32_1 = arith.constant 0 : i32
    return %c0_i32, %c0_i32_0 : i32, i32
  }
  func.func @transform_4(%arg0: i32) -> (i32, i32) {
    %c0_i32 = arith.constant 0 : i32
    %c0_i32_0 = arith.constant 0 : i32
    %c0_i32_1 = arith.constant 0 : i32
    return %c0_i32, %c0_i32_0 : i32, i32
  }
  func.func @transform_5(%arg0: i32) -> (i32, i32) {
    %c0_i32 = arith.constant 0 : i32
    %c0_i32_0 = arith.constant 0 : i32
    %c0_i32_1 = arith.constant 0 : i32
    return %c0_i32, %c0_i32_0 : i32, i32
  }
  func.func @transform_6(%arg0: i32) -> (i32, i32) {
    %c0_i32 = arith.constant 0 : i32
    %c0_i32_0 = arith.constant 0 : i32
    %c0_i32_1 = arith.constant 0 : i32
    return %c0_i32, %c0_i32_0 : i32, i32
  }
  func.func @transform_7(%arg0: i32) -> (i32, i32) {
    %c0_i32 = arith.constant 0 : i32
    %c0_i32_0 = arith.constant 0 : i32
    %c0_i32_1 = arith.constant 0 : i32
    return %c0_i32, %c0_i32_0 : i32, i32
  }
  func.func @transform_8(%arg0: i32) -> (i32, i32) {
    %c0_i32 = arith.constant 0 : i32
    %c0_i32_0 = arith.constant 0 : i32
    %c0_i32_1 = arith.constant 0 : i32
    return %c0_i32, %c0_i32_0 : i32, i32
  }
  func.func @transform_9(%arg0: i32) -> (i32, i32) {
    %c0_i32 = arith.constant 0 : i32
    %c0_i32_0 = arith.constant 0 : i32
    %c0_i32_1 = arith.constant 0 : i32
    return %c0_i32, %c0_i32_0 : i32, i32
  }
}

</mosaic_0001>

<bundles_post_ra>
// kernel: tpu_custom_call.1
= control target key start
LH: loop header
LB: loop body
LE: loop exit
PB: predicated region body
PF: predicated region fallthrough
CT: control target
= control target key end

     0   :  { %14 = vsyncpa [#allocation3], 0  ;;  %s1535_s0 = inlined_call_operand.vmem [shape: f32[4,512], index: 0, kind: input, shape index: {}]   ;;  %s1536_s1 = inlined_call_operand.hbm [shape: f32[8,512], index: 1, kind: input, shape index: {}]   ;;  %s1537_s2 = inlined_call_operand.hbm [shape: f32[9,512], index: 2, kind: input, shape index: {}]   ;;  %s1538_s3 = inlined_call_operand.vmem [shape: bf16[8,4], index: 3, kind: input, shape index: {}]   ;;  %s1539_s4 = inlined_call_operand.vmem [shape: bf16[8,8], index: 4, kind: input, shape index: {}]   ;;  %s1540_s5 = inlined_call_operand.vmem [shape: bf16[8,8], index: 5, kind: input, shape index: {}]   ;;  %s1541_s6 = inlined_call_operand.vmem [shape: bf16[8,8], index: 6, kind: input, shape index: {}]   ;;  %s1542_s7 = inlined_call_operand.vmem [shape: bf16[8,72], index: 7, kind: input, shape index: {}]   ;;  %s1543_s8 = inlined_call_operand.vmem [shape: f32[8,4], index: 8, kind: input, shape index: {}]   ;;  %s1544_s9 = inlined_call_operand.hbm [shape: f32[8,512], index: 9, kind: output, shape index: {}]  }
   0x1   :  { %15 = vsyncpa [#allocation6], 0 }
   0x2   :  { %16 = vsyncpa [#allocation4], 0  ;;  %s1160_s30 = smov [#allocation2]   ;;  %s1161_s11 = smov [#allocation5]  }
   0x3   :  { %s25_s10 = sshll.u32 %s1160_s30, 4  ;;  %s34_s12 = sshll.u32 %s1161_s11, 4  ;;  %s26_s10 = int_to_ptr.vmem [resolvable:$true] %s25_s10  ;;  %s1227_s12 = int_to_ptr.vmem [resolvable:$true] %s34_s12 }
   0x4   :  { %s1088_s15 = scalar_lea.hbm %s1536_s1, 512 }
   0x5   :  { %p1089_p0 = scmp.ne.s32.totalorder %s1536_s1, %s1088_s15  ;;  %p1092_p1 = scmp.lt.u32.totalorder %s1088_s15, %s1536_s1 }
   0x7   :  { %p1094_p2 = pnand %p1092_p1, %p1089_p0 }
   0x9   :  { %1097 = shalt.err (!%p1094_p2)
}
   0xa   :  { %s1098_s20 = scalar_lea.vmem %s26_s10, 512  ;;  %p1103_p4 = scmp.lt.s32.totalorder %s26_s10, %s26_s10 }
   0xb   :  { %p1099_p3 = scmp.ne.s32.totalorder %s26_s10, %s1098_s20  ;;  %p1104_p5 = scmp.lt.s32.totalorder %s1098_s20, %s1098_s20 }
   0xd   :  { %p1105_p6 = por %p1104_p5, %p1103_p4 }
   0xf   :  { %p1106_p7 = pnand %p1105_p6, %p1099_p3 }
  0x11   :  { %1109 = shalt.err (!%p1106_p7)
}
  0x12   :  { %28 = dma.hbm_to_vmem [thread:$0]  %s1536_s1, 512, %s26_s10, [#allocation3]  }
  0x13   :  { %s1110_s25 = scalar_lea.hbm %s1537_s2, 1024 }
  0x14   :  { %p1111_p8 = scmp.ne.s32.totalorder %s1537_s2, %s1110_s25  ;;  %p1114_p9 = scmp.lt.u32.totalorder %s1110_s25, %s1537_s2 }
  0x16   :  { %p1116_p10 = pnand %p1114_p9, %p1111_p8 }
  0x18   :  { %1119 = shalt.err (!%p1116_p10)
}
  0x19   :  { %s1120_s30 = scalar_lea.vmem %s1227_s12, 1024  ;;  %p1125_p12 = scmp.lt.s32.totalorder %s1227_s12, %s1227_s12 }
  0x1a   :  { %p1121_p11 = scmp.ne.s32.totalorder %s1227_s12, %s1120_s30  ;;  %p1126_p13 = scmp.lt.s32.totalorder %s1120_s30, %s1120_s30 }
  0x1c   :  { %p1127_p0 = por %p1126_p13, %p1125_p12 }
  0x1e   :  { %p1128_p1 = pnand %p1127_p0, %p1121_p11 }
  0x20   :  { %1131 = shalt.err (!%p1128_p1)
}
  0x21   :  { %s1162_s1 = smov 512   ;;  %s1163_s10 = smov 32  }
  0x22   :  { %40 = dma.hbm_to_vmem [thread:$0]  %s1537_s2, 1024, %s1227_s12, [#allocation6], %s1162_s1, %s1162_s1, %s1163_s10  }
  0x23   :  { %1154 = dma.done.wait [#allocation3], 512  }
  0x24   :  { %1155 = vsyncadd [#allocation3], 4294966784 }
  0x25   :  { %1156 = dma.done.wait [#allocation6], 1024  }
  0x26   :  { %1157 = vsyncadd [#allocation6], 4294966272  ;;  %v1164_v0 = vmov 0   ;;  %v1165_v1 = vmov 1   ;;  %v61_v2 = vld [vmem:[%s1535_s0] sm:$0xff]  ;;  %vm91_vm0 = vcmask 1041408  }
  0x27   :  { %136 = vmatprep.mubr.bf16.mxu0 %v1164_v0  ;;  %177 = vmatprep.mubr.bf16.mxu1 %v1164_v0  ;;  %v62_v3 = vld [vmem:[%s1535_s0 + $0x8] sm:$0xff]  ;;  %v65_v4 = vcombine.high %v61_v2, %v61_v2  ;;  %v69_v6 = vpack.c.bf16 %v61_v2, %v61_v2  ;;  %v76_v9 = vld [vmem:[#allocation2 + $0x18] sm:$0xff]  ;;  %v73_v10 = vld [vmem:[#allocation2] sm:$0xff]  ;;  %vm199_vm1 = vcmask 1043456   ;;  %vm87_vm2 = vcmask 31744   ;;  %s1168_s21 = smov 16  }
  0x28   :  { %1066 = vset.pattern.permute.xlu0 %v1165_v1  ;;  %v66_v5 = vcombine.high %v62_v3, %v62_v3  ;;  %v71_v7 = vpack.c.bf16 %v62_v3, %v62_v3  ;;  %v74_v8 = vld [vmem:[#allocation2 + $0x8] sm:$0xff]  ;;  %v80_v12 = vpack.c.bf16 %v76_v9, %v76_v9  ;;  %v77_v13 = vpack.c.bf16 %v73_v10, %v73_v10  ;;  %v75_v14 = vld [vmem:[#allocation2 + $0x10] sm:$0xff]  ;;  %v1269_v15 = vld [vmem:[%s1543_s8] sm:$0xff]  ;;  %s1169_s22 = smov 15   ;;  %s1170_s23 = smov 1  }
  0x29   :  { %v78_v11 = vpack.c.bf16 %v74_v8, %v74_v8  ;;  %v70_v16 = vpack.c.bf16 %v65_v4, %v65_v4  ;;  %v93_v18 = vsel %vm91_vm0, %v69_v6, 0  ;;  %192 = vperm.xlu0 %1066, %v1269_v15   ;;  %v79_v20 = vpack.c.bf16 %v75_v14, %v75_v14  ;;  %v81_v21 = vld [vmem:[%s1538_s3] sm:$0xf]  ;;  %s1171_s24 = smov 127   ;;  %s1172_s25 = smov 113  }
  0x2a   :  { %v72_v17 = vpack.c.bf16 %v66_v5, %v66_v5  ;;  %v99_v19 = vsel %vm91_vm0, %v71_v7, 0  ;;  %v201_v22 = vsel %vm199_vm1, %v77_v13, 0  ;;  %v190_v24 = vld [vmem:[%s1539_s4] sm:$0xf]  ;;  %vm195_vm3 = vcmask 64512   ;;  %s1173_s26 = smov 112  }
  0x2b   :  { %1025 = vmatprep.subr.msk.bf16.mxu0 %vm91_vm0, %v70_v16  ;;  %v207_v23 = vsel %vm199_vm1, %v79_v20, 0  ;;  %v1166_v25 = vmov 2   ;;  %v303_v7 = vld [vmem:[%s1541_s6] sm:$0xf]  ;;  %s1174_s27 = smov 111   ;;  %vm860_vm12 = vcmask 588800  }
  0x2c   :  { %1027 = vmatprep.subr.msk.bf16.mxu1 %vm91_vm0, %v72_v17  ;;  %105 = vmatpush1.bf16.msra.mxu0 %v93_v18  ;;  %v298_v10 = vld [vmem:[%s1540_s5] sm:$0xf]  ;;  %s1167_s5 = smov 17  }
  0x2d   :  { %146 = vmatpush1.bf16.msra.mxu1 %v99_v19  ;;  %1029 = vmatprep.subr.msk.bf16.mxu0 %vm199_vm1, %v78_v11 }
  0x2e   :  { %1031 = vmatprep.subr.msk.bf16.mxu1 %vm199_vm1, %v80_v12  ;;  %1067 = vset.pattern.permute.xlu0 %v1164_v0 }
  0x2f   :  { %1026 = vmatmul.mubr.msk.bf16.vlgmr.msra.gmra.mrb[0].mxu0 %vm87_vm2, %v81_v21  ;;  %84 = vperm.xlu0 %1067, %v1269_v15  }
  0x30   :  { %1028 = vmatmul.mubr.msk.bf16.vlgmr.msra.gmra.mrb[0].mxu1 %vm87_vm2, %v81_v21  ;;  %213 = vmatpush1.bf16.msra.mxu0 %v201_v22 }
  0x31   :  { %254 = vmatpush1.bf16.msra.mxu1 %v207_v23  ;;  %244 = vmatprep.mubr.bf16.mxu0 %v1164_v0 }
  0x32   :  { %285 = vmatprep.mubr.bf16.mxu1 %v1164_v0  ;;  %1068 = vset.pattern.permute.xlu1 %v1166_v25 }
  0x33   :  { %503 = vperm.xlu1 %1068, %v1269_v15  }
  0x37   :  { %1030 = vmatmul.mubr.msk.bf16.vlgmr.msra.gmra.mrb[4].mxu0 %vm195_vm3, %v190_v24 }
  0x38   :  { %1032 = vmatmul.mubr.msk.bf16.vlgmr.msra.gmra.mrb[4].mxu1 %vm195_vm3, %v190_v24  ;;  %355 = vmatprep.mubr.bf16.mxu0 %v1164_v0 }
  0x39   :  { %396 = vmatprep.mubr.bf16.mxu1 %v1164_v0 }
  0xa8   :  { %v193_v26 = vpop.permute.xlu0 %192 }
  0xae   :  { %v85_v35 = vpop.permute.xlu0 %84 }
  0xb2   :  { %v504_v20 = vpop.permute.xlu1 %503 }
 0x102   :  { %v138_v27 = vpop.f32.mrb[0].mxu0 }
 0x103   :  { %v179_v28 = vpop.f32.mrb[0].mxu1  ;;  %v140_v29 = vpop.f32.mrb[1].mxu0  ;;  %v139_v36 = vadd.f32 %v138_v27, %v85_v35 }
 0x104   :  { %v181_v30 = vpop.f32.mrb[1].mxu1  ;;  %v142_v31 = vpop.f32.mrb[2].mxu0  ;;  %v180_v37 = vadd.f32 %v179_v28, %v85_v35  ;;  %v141_v38 = vadd.f32 %v140_v29, %v85_v35 }
 0x105   :  { %v183_v32 = vpop.f32.mrb[2].mxu1  ;;  %v143_v33 = vpop.f32.mrb[3].mxu0  ;;  %v182_v39 = vadd.f32 %v181_v30, %v85_v35  ;;  %v1295_v50 = vmax.f32 %v139_v36, 0.0 }
 0x106   :  { %v184_v34 = vpop.f32.mrb[3].mxu1  ;;  %v1297_v51 = vmax.f32 %v180_v37, 0.0  ;;  %v1303_v56 = vmax.f32 %v141_v38, 0.0 }
 0x107   :  { %v1305_v57 = vmax.f32 %v182_v39, 0.0  ;;  %v299_v6 = vpack.c.bf16 %v1295_v50, %v1295_v50 }
 0x108   :  { %v301_v1 = vpack.c.bf16 %v1297_v51, %v1297_v51  ;;  %v300_v4 = vpack.c.bf16 %v1303_v56, %v1303_v56 }
 0x109   :  { %v302_v5 = vpack.c.bf16 %v1305_v57, %v1305_v57  ;;  %v409_v8 = vsel %vm199_vm1, %v299_v6, 0 }
 0x10a   :  { %v246_v40 = vpop.f32.mrb[4].mxu0  ;;  %v415_v9 = vsel %vm199_vm1, %v301_v1, 0 }
 0x10b   :  { %v287_v41 = vpop.f32.mrb[4].mxu1  ;;  %v247_v42 = vadd.f32 %v246_v40, %v193_v26  ;;  %v248_v44 = vpop.f32.mrb[5].mxu0  ;;  %v1175_v40 = vmov 3  }
 0x10c   :  { %v288_v43 = vadd.f32 %v287_v41, %v193_v26  ;;  %v289_v45 = vpop.f32.mrb[5].mxu1  ;;  %v249_v46 = vadd.f32 %v248_v44, %v193_v26  ;;  %v250_v48 = vpop.f32.mrb[6].mxu0  ;;  %1069 = vset.pattern.permute.xlu0 %v1175_v40  ;;  %v522_v41 = vlaneseq }
 0x10d   :  { %v290_v47 = vadd.f32 %v289_v45, %v193_v26  ;;  %v291_v49 = vpop.f32.mrb[6].mxu1  ;;  %v1299_v52 = vmax.f32 %v247_v42, 0.0  ;;  %v251_v54 = vpop.f32.mrb[7].mxu0 }
 0x10e   :  { %v1301_v53 = vmax.f32 %v288_v43, 0.0  ;;  %v292_v55 = vpop.f32.mrb[7].mxu1  ;;  %v1307_v58 = vmax.f32 %v249_v46, 0.0  ;;  %v532_v44 = vshrl.u32 %v522_v41, 7  ;;  %v1390_v46 = vand.u32 127, %v522_v41 }
 0x10f   :  { %v1309_v59 = vmax.f32 %v290_v47, 0.0  ;;  %v304_v60 = vpack.c.bf16 %v1299_v52, %v1299_v52  ;;  %v529_v49 = vld [vmem:[#allocation5] ss:$8 sm:$0xf] }
 0x110   :  { %v306_v61 = vpack.c.bf16 %v1301_v53, %v1301_v53  ;;  %v305_v62 = vpack.c.bf16 %v1307_v58, %v1307_v58  ;;  %v1392_v48 = vsub.s32 1, %v532_v44  ;;  %v569_v54 = vld [vmem:[#allocation5 + $0x1] ss:$8 sm:$0xf]  ;;  %vm524_vm4 = vcmp.lt.s32.totalorder %v1390_v46, 17 }
 0x111   :  { %v307_v63 = vpack.c.bf16 %v1309_v59, %v1309_v59  ;;  %v312_v2 = vsel %vm199_vm1, %v304_v60, 0  ;;  %v1395_v60 = vsub.s32 0, %v532_v44  ;;  %vm563_vm5 = vcmp.lt.s32.totalorder %v1390_v46, 16 }
 0x112   :  { %v318_v3 = vsel %vm199_vm1, %v306_v61, 0  ;;  %1033 = vmatprep.subr.msk.bf16.mxu0 %vm199_vm1, %v305_v62  ;;  %v1397_v61 = vsub.s32 3, %v532_v44  ;;  %v538_v62 = vrot.slane %v529_v49, %v1392_v48  ;;  %v1402_v1 = vsub.s32 2, %v532_v44 }
 0x113   :  { %1035 = vmatprep.subr.msk.bf16.mxu1 %vm199_vm1, %v307_v63  ;;  %324 = vmatpush1.bf16.msra.mxu0 %v312_v2  ;;  %v578_v63 = vrot.slane %v569_v54, %v1392_v48  ;;  %vm603_vm6 = vcmp.lt.s32.totalorder %v1390_v46, 15  ;;  %vm643_vm7 = vcmp.lt.s32.totalorder %v1390_v46, 1  ;;  %vm683_vm8 = vcmp.lt.s32.totalorder %v1390_v46, 127 }
 0x114   :  { %365 = vmatpush1.bf16.msra.mxu1 %v318_v3  ;;  %1037 = vmatprep.subr.msk.bf16.mxu0 %vm199_vm1, %v300_v4  ;;  %v534_v3 = vrot.slane %v529_v49, %v1395_v60  ;;  %v546_v6 = vrot.slane %v529_v49, %v1397_v61  ;;  %vm723_vm9 = vcmp.lt.s32.totalorder %v1390_v46, 113  ;;  %vm763_vm10 = vcmp.lt.s32.totalorder %v1390_v46, 112 }
 0x115   :  { %1039 = vmatprep.subr.msk.bf16.mxu1 %vm199_vm1, %v302_v5  ;;  %vm803_vm11 = vcmp.lt.s32.totalorder %v1390_v46, 111 }
 0x116   :  { %1034 = vmatmul.mubr.msk.bf16.vlgmr.msra.gmra.mrb[8].mxu0 %vm195_vm3, %v303_v7 }
 0x117   :  { %1036 = vmatmul.mubr.msk.bf16.vlgmr.msra.gmra.mrb[8].mxu1 %vm195_vm3, %v303_v7  ;;  %421 = vmatpush1.bf16.msra.mxu0 %v409_v8  ;;  %v582_v7 = vrot.slane %v569_v54, %v1402_v1 }
 0x118   :  { %462 = vmatpush1.bf16.msra.mxu1 %v415_v9  ;;  %452 = vmatprep.mubr.bf16.mxu0 %v1164_v0  ;;  %v574_v9 = vrot.slane %v569_v54, %v1395_v60 }
 0x119   :  { %493 = vmatprep.mubr.bf16.mxu1 %v1164_v0 }
 0x11e   :  { %1038 = vmatmul.mubr.msk.bf16.vlgmr.msra.gmra.mrb[12].mxu0 %vm195_vm3, %v298_v10 }
 0x11f   :  { %1040 = vmatmul.mubr.msk.bf16.vlgmr.msra.gmra.mrb[12].mxu1 %vm195_vm3, %v298_v10  ;;  %908 = vmatprep.mubr.bf16.mxu0 %v1164_v0 }
 0x120   :  { %949 = vmatprep.mubr.bf16.mxu1 %v1164_v0 }
 0x1e9   :  { %v357_v11 = vpop.f32.mrb[8].mxu0 }
 0x1ea   :  { %v398_v12 = vpop.f32.mrb[8].mxu1  ;;  %v359_v13 = vpop.f32.mrb[9].mxu0 }
 0x1eb   :  { %v400_v14 = vpop.f32.mrb[9].mxu1  ;;  %v361_v16 = vpop.f32.mrb[10].mxu0 }
 0x1ec   :  { %v402_v17 = vpop.f32.mrb[10].mxu1  ;;  %v362_v18 = vpop.f32.mrb[11].mxu0 }
 0x1ed   :  { %v403_v19 = vpop.f32.mrb[11].mxu1 }
 0x1f1   :  { %v454_v21 = vpop.f32.mrb[12].mxu0 }
 0x1f2   :  { %v495_v22 = vpop.f32.mrb[12].mxu1  ;;  %v455_v23 = vadd.f32 %v454_v21, %v357_v11  ;;  %v456_v25 = vpop.f32.mrb[13].mxu0 }
 0x1f3   :  { %v496_v24 = vadd.f32 %v495_v22, %v398_v12  ;;  %v497_v26 = vpop.f32.mrb[13].mxu1  ;;  %v457_v27 = vadd.f32 %v456_v25, %v359_v13  ;;  %v458_v28 = vpop.f32.mrb[14].mxu0  ;;  %v586_v13 = vrot.slane %v569_v54, %v1397_v61 }
 0x1f4   :  { %v498_v29 = vadd.f32 %v497_v26, %v400_v14  ;;  %v499_v30 = vpop.f32.mrb[14].mxu1  ;;  %v506_v0 = vadd.f32 %v504_v20, %v455_v23  ;;  %v459_v32 = vpop.f32.mrb[15].mxu0  ;;  %v542_v14 = vrot.slane %v529_v49, %v1402_v1 }
 0x1f5   :  { %v508_v31 = vadd.f32 %v504_v20, %v496_v24  ;;  %v500_v33 = vpop.f32.mrb[15].mxu1  ;;  %v507_v34 = vadd.f32 %v504_v20, %v457_v27 }
 0x1f6   :  { %v1349_v35 = vmax.f32 %v506_v0, 0.0  ;;  %v509_v38 = vadd.f32 %v504_v20, %v498_v29 }
 0x1f7   :  { %v1351_v36 = vmax.f32 %v508_v31, 0.0  ;;  %v1355_v37 = vmax.f32 %v507_v34, 0.0  ;;  %v609_v34 = vld [vmem:[#allocation5 + $0x2] ss:$8 sm:$0xf] }
 0x1f8   :  { %514 = vrot.lane.b32.xlu1 %v1349_v35, %s1167_s5  ;;  %v1359_v39 = vmax.f32 %v509_v38, 0.0  ;;  %v649_v38 = vld [vmem:[#allocation5 + $0x3] ss:$8 sm:$0xf]  ;;  %v626_v54 = vrot.slane %v609_v34, %v1397_v61 }
 0x1f9   :  { %518 = vrot.lane.b32.xlu0 %v1351_v36, %s1167_s5 }
 0x1fc   :  { %516 = vrot.lane.b32.xlu1 %v1355_v37, %s1167_s5 }
 0x1fd   :  { %555 = vrot.lane.b32.xlu0 %v1349_v35, %s1168_s21 }
 0x200   :  { %520 = vrot.lane.b32.xlu1 %v1359_v39, %s1167_s5 }
 0x201   :  { %559 = vrot.lane.b32.xlu0 %v1351_v36, %s1168_s21 }
 0x204   :  { %557 = vrot.lane.b32.xlu1 %v1355_v37, %s1168_s21 }
 0x205   :  { %595 = vrot.lane.b32.xlu0 %v1349_v35, %s1169_s22 }
 0x208   :  { %561 = vrot.lane.b32.xlu1 %v1359_v39, %s1168_s21 }
 0x209   :  { %599 = vrot.lane.b32.xlu0 %v1351_v36, %s1169_s22 }
 0x20c   :  { %597 = vrot.lane.b32.xlu1 %v1355_v37, %s1169_s22 }
 0x20d   :  { %635 = vrot.lane.b32.xlu0 %v1349_v35, %s1170_s23 }
 0x210   :  { %601 = vrot.lane.b32.xlu1 %v1359_v39, %s1169_s22 }
 0x211   :  { %639 = vrot.lane.b32.xlu0 %v1351_v36, %s1170_s23 }
 0x214   :  { %637 = vrot.lane.b32.xlu1 %v1355_v37, %s1170_s23 }
 0x215   :  { %675 = vrot.lane.b32.xlu0 %v1349_v35, %s1171_s24 }
 0x218   :  { %641 = vrot.lane.b32.xlu1 %v1359_v39, %s1170_s23 }
 0x219   :  { %679 = vrot.lane.b32.xlu0 %v1351_v36, %s1171_s24 }
 0x21c   :  { %677 = vrot.lane.b32.xlu1 %v1355_v37, %s1171_s24 }
 0x21d   :  { %715 = vrot.lane.b32.xlu0 %v1349_v35, %s1172_s25 }
 0x220   :  { %681 = vrot.lane.b32.xlu1 %v1359_v39, %s1171_s24 }
 0x221   :  { %719 = vrot.lane.b32.xlu0 %v1351_v36, %s1172_s25 }
 0x224   :  { %717 = vrot.lane.b32.xlu1 %v1355_v37, %s1172_s25 }
 0x225   :  { %755 = vrot.lane.b32.xlu0 %v1349_v35, %s1173_s26 }
 0x228   :  { %721 = vrot.lane.b32.xlu1 %v1359_v39, %s1172_s25 }
 0x229   :  { %759 = vrot.lane.b32.xlu0 %v1351_v36, %s1173_s26 }
 0x22c   :  { %757 = vrot.lane.b32.xlu1 %v1355_v37, %s1173_s26 }
 0x22d   :  { %795 = vrot.lane.b32.xlu0 %v1349_v35, %s1174_s27 }
 0x230   :  { %761 = vrot.lane.b32.xlu1 %v1359_v39, %s1173_s26 }
 0x231   :  { %799 = vrot.lane.b32.xlu0 %v1351_v36, %s1174_s27 }
 0x234   :  { %797 = vrot.lane.b32.xlu1 %v1355_v37, %s1174_s27 }
 0x235   :  { %857 = vperm.xlu0 %1069, %v1269_v15  }
 0x238   :  { %801 = vrot.lane.b32.xlu1 %v1359_v39, %s1174_s27 }
 0x26a   :  { %v515_v43 = vpop.permute.xlu1 %514 }
 0x26b   :  { %v519_v42 = vpop.permute.xlu0 %518 }
 0x26e   :  { %v517_v47 = vpop.permute.xlu1 %516 }
 0x26f   :  { %v556_v45 = vpop.permute.xlu0 %555  ;;  %v527_v2 = vsel %vm524_vm4, %v515_v43, %v517_v47  ;;  %v526_v18 = vsel %vm524_vm4, %v517_v47, %v519_v42 }
 0x270   :  { %v552_v10 = vmul.f32 %v538_v62, %v527_v2  ;;  %v553_v29 = vmul.f32 %v542_v14, %v526_v18  ;;  %v654_v62 = vrot.slane %v649_v38, %v1395_v60 }
 0x272   :  { %v521_v15 = vpop.permute.xlu1 %520 }
 0x273   :  { %v560_v55 = vpop.permute.xlu0 %559  ;;  %v525_v16 = vsel %vm524_vm4, %v519_v42, %v521_v15  ;;  %v528_v17 = vsel %vm524_vm4, %v521_v15, %v515_v43  ;;  %v618_v42 = vrot.slane %v609_v34, %v1392_v48  ;;  %v658_v43 = vrot.slane %v649_v38, %v1392_v48 }
 0x274   :  { %v551_v25 = vmul.f32 %v534_v3, %v528_v17  ;;  %v554_v26 = vmul.f32 %v546_v6, %v525_v16  ;;  %v666_v6 = vrot.slane %v649_v38, %v1397_v61 }
 0x276   :  { %v558_v5 = vpop.permute.xlu1 %557 }
 0x277   :  { %v596_v4 = vpop.permute.xlu0 %595  ;;  %v566_v8 = vsel %vm563_vm5, %v556_v45, %v558_v5  ;;  %v565_v11 = vsel %vm563_vm5, %v558_v5, %v560_v55 }
 0x278   :  { %v592_v12 = vmul.f32 %v578_v63, %v566_v8  ;;  %v593_v22 = vmul.f32 %v582_v7, %v565_v11  ;;  %v689_v63 = vld [vmem:[#allocation5 + $0x5] ss:$8 sm:$0xf]  ;;  %v622_v7 = vrot.slane %v609_v34, %v1402_v1 }
 0x279   :  { %v694_v14 = vrot.slane %v689_v63, %v1395_v60 }
 0x27a   :  { %v562_v20 = vpop.permute.xlu1 %561  ;;  %v836_v21 = vpack.c.bf16 %v592_v12, %v552_v10  ;;  %v837_v33 = vpack.c.bf16 %v593_v22, %v553_v29 }
 0x27b   :  { %v600_v19 = vpop.permute.xlu0 %599  ;;  %v564_v23 = vsel %vm563_vm5, %v560_v55, %v562_v20  ;;  %v567_v24 = vsel %vm563_vm5, %v562_v20, %v556_v45  ;;  %v614_v45 = vrot.slane %v609_v34, %v1395_v60  ;;  %v662_v55 = vrot.slane %v649_v38, %v1402_v1 }
 0x27c   :  { %v591_v27 = vmul.f32 %v574_v9, %v567_v24  ;;  %v594_v28 = vmul.f32 %v586_v13, %v564_v23  ;;  %876 = vmatprep.subr.bf16.mxu0 %v836_v21  ;;  %v698_v20 = vrot.slane %v689_v63, %v1392_v48 }
 0x27e   :  { %v835_v30 = vpack.c.bf16 %v591_v27, %v551_v25  ;;  %v598_v31 = vpop.permute.xlu1 %597  ;;  %v838_v32 = vpack.c.bf16 %v594_v28, %v554_v26 }
 0x27f   :  { %v636_v0 = vpop.permute.xlu0 %635  ;;  %v606_v44 = vsel %vm603_vm6, %v596_v4, %v598_v31  ;;  %v605_v10 = vsel %vm603_vm6, %v598_v31, %v600_v19 }
 0x280   :  { %877 = vmatpush1.bf16.msra.mxu0 %v835_v30  ;;  %917 = vmatprep.subr.bf16.mxu1 %v838_v32  ;;  %v632_v2 = vmul.f32 %v618_v42, %v606_v44  ;;  %v633_v23 = vmul.f32 %v622_v7, %v605_v10 }
 0x281   :  { %918 = vmatpush1.bf16.msra.mxu1 %v837_v33  ;;  %v706_v33 = vrot.slane %v689_v63, %v1397_v61 }
 0x282   :  { %v602_v41 = vpop.permute.xlu1 %601 }
 0x283   :  { %v640_v40 = vpop.permute.xlu0 %639  ;;  %v604_v8 = vsel %vm603_vm6, %v600_v19, %v602_v41  ;;  %v607_v9 = vsel %vm603_vm6, %v602_v41, %v596_v4 }
 0x284   :  { %v631_v4 = vmul.f32 %v614_v45, %v607_v9  ;;  %v634_v21 = vmul.f32 %v626_v54, %v604_v8 }
 0x286   :  { %v638_v49 = vpop.permute.xlu1 %637 }
 0x287   :  { %v676_v47 = vpop.permute.xlu0 %675  ;;  %v646_v15 = vsel %vm643_vm7, %v636_v0, %v638_v49  ;;  %v645_v3 = vsel %vm643_vm7, %v638_v49, %v640_v40 }
 0x288   :  { %v672_v5 = vmul.f32 %v658_v43, %v646_v15  ;;  %v673_v16 = vmul.f32 %v662_v55, %v645_v3  ;;  %v729_v15 = vld [vmem:[#allocation5 + $0x6] ss:$8 sm:$0xf] }
 0x289   :  { %v746_v7 = vrot.slane %v729_v15, %v1397_v61 }
 0x28a   :  { %v642_v12 = vpop.permute.xlu1 %641  ;;  %v840_v13 = vpack.c.bf16 %v672_v5, %v632_v2  ;;  %v841_v28 = vpack.c.bf16 %v673_v16, %v633_v23  ;;  %v738_v2 = vrot.slane %v729_v15, %v1392_v48 }
 0x28b   :  { %v680_v11 = vpop.permute.xlu0 %679  ;;  %v644_v17 = vsel %vm643_vm7, %v640_v40, %v642_v12  ;;  %v647_v18 = vsel %vm643_vm7, %v642_v12, %v636_v0  ;;  %v702_v0 = vrot.slane %v689_v63, %v1402_v1 }
 0x28c   :  { %v671_v22 = vmul.f32 %v654_v62, %v647_v18  ;;  %v674_v19 = vmul.f32 %v666_v6, %v644_v17  ;;  %878 = vmatprep.subr.bf16.mxu0 %v840_v13  ;;  %v742_v6 = vrot.slane %v729_v15, %v1402_v1 }
 0x28e   :  { %v839_v24 = vpack.c.bf16 %v671_v22, %v631_v4  ;;  %v678_v26 = vpop.permute.xlu1 %677  ;;  %v842_v27 = vpack.c.bf16 %v674_v19, %v634_v21 }
 0x28f   :  { %v716_v25 = vpop.permute.xlu0 %715  ;;  %v685_v29 = vsel %vm683_vm8, %v678_v26, %v680_v11  ;;  %v686_v30 = vsel %vm683_vm8, %v676_v47, %v678_v26 }
 0x290   :  { %v711_v31 = vmul.f32 %v694_v14, %v686_v30  ;;  %v712_v32 = vmul.f32 %v698_v20, %v685_v29  ;;  %879 = vmatpush1.bf16.msra.mxu0 %v839_v24  ;;  %919 = vmatprep.subr.bf16.mxu1 %v842_v27  ;;  %v809_v20 = vld [vmem:[#allocation5 + $0x20] ss:$8 sm:$0xf] }
 0x291   :  { %920 = vmatpush1.bf16.msra.mxu1 %v841_v28  ;;  %v814_v27 = vrot.slane %v809_v20, %v1395_v60  ;;  %v818_v28 = vrot.slane %v809_v20, %v1392_v48 }
 0x292   :  { %v843_v34 = vpack.c.bf16 %v711_v31, %v1349_v35  ;;  %v682_v40 = vpop.permute.xlu1 %681  ;;  %v844_v41 = vpack.c.bf16 %v712_v32, %v1355_v37  ;;  %v769_v37 = vld [vmem:[#allocation5 + $0x7] ss:$8 sm:$0xf] }
 0x293   :  { %v720_v38 = vpop.permute.xlu0 %719  ;;  %v684_v42 = vsel %vm683_vm8, %v680_v11, %v682_v40  ;;  %v687_v43 = vsel %vm683_vm8, %v682_v40, %v676_v47  ;;  %v734_v47 = vrot.slane %v729_v15, %v1395_v60  ;;  %v778_v3 = vrot.slane %v769_v37, %v1392_v48 }
 0x294   :  { %v713_v44 = vmul.f32 %v702_v0, %v684_v42  ;;  %v714_v45 = vmul.f32 %v706_v33, %v687_v43  ;;  %880 = vmatprep.subr.bf16.mxu0 %v844_v41  ;;  %v782_v11 = vrot.slane %v769_v37, %v1402_v1  ;;  %v786_v12 = vrot.slane %v769_v37, %v1397_v61 }
 0x295   :  { %881 = vmatpush1.bf16.msra.mxu0 %v843_v34  ;;  %v822_v48 = vrot.slane %v809_v20, %v1402_v1  ;;  %v826_v42 = vrot.slane %v809_v20, %v1397_v61  ;;  %v855_v61 = vld [vmem:[%s1542_s7] sm:$0xf]  ;;  %s1176_s7 = smov [#allocation7]  }
 0x296   :  { %v845_v49 = vpack.c.bf16 %v713_v44, %v1351_v36  ;;  %v718_v55 = vpop.permute.xlu1 %717  ;;  %v846_v35 = vpack.c.bf16 %v714_v45, %v1359_v39  ;;  %v774_v36 = vrot.slane %v769_v37, %v1395_v60  ;;  %s1015_s30 = sshll.u32 %s1176_s7, 4  ;;  %s1016_s30 = int_to_ptr.vmem [resolvable:$true] %s1015_s30 }
 0x297   :  { %v756_v54 = vpop.permute.xlu0 %755  ;;  %v725_v39 = vsel %vm723_vm9, %v718_v55, %v720_v38  ;;  %v726_v5 = vsel %vm723_vm9, %v716_v25, %v718_v55  ;;  %s1132_s1 = scalar_lea.vmem %s1016_s30, 512  ;;  %p1137_p3 = scmp.lt.s32.totalorder %s1016_s30, %s1016_s30 }
 0x298   :  { %921 = vmatprep.subr.bf16.mxu1 %v846_v35  ;;  %v751_v13 = vmul.f32 %v734_v47, %v726_v5  ;;  %v752_v14 = vmul.f32 %v738_v2, %v725_v39  ;;  %p1133_p2 = scmp.ne.s32.totalorder %s1016_s30, %s1132_s1  ;;  %p1138_p4 = scmp.lt.s32.totalorder %s1132_s1, %s1132_s1 }
 0x299   :  { %922 = vmatpush1.bf16.msra.mxu1 %v845_v49 }
 0x29a   :  { %v722_v63 = vpop.permute.xlu1 %721  ;;  %p1139_p5 = por %p1138_p4, %p1137_p3 }
 0x29b   :  { %v760_v62 = vpop.permute.xlu0 %759  ;;  %v724_v4 = vsel %vm723_vm9, %v720_v38, %v722_v63  ;;  %v727_v21 = vsel %vm723_vm9, %v722_v63, %v716_v25 }
 0x29c   :  { %v753_v29 = vmul.f32 %v742_v6, %v724_v4  ;;  %v754_v30 = vmul.f32 %v746_v7, %v727_v21  ;;  %p1140_p6 = pnand %p1139_p5, %p1133_p2 }
 0x29e   :  { %v758_v8 = vpop.permute.xlu1 %757 }
 0x29f   :  { %v765_v9 = vsel %vm763_vm10, %v758_v8, %v760_v62  ;;  %v766_v10 = vsel %vm763_vm10, %v756_v54, %v758_v8  ;;  %v796_v16 = vpop.permute.xlu0 %795 }
 0x2a0   :  { %v791_v17 = vmul.f32 %v774_v36, %v766_v10  ;;  %v792_v18 = vmul.f32 %v778_v3, %v765_v9 }
 0x2a2   :  { %v847_v22 = vpack.c.bf16 %v791_v17, %v751_v13  ;;  %v762_v19 = vpop.permute.xlu1 %761  ;;  %v848_v23 = vpack.c.bf16 %v792_v18, %v752_v14 }
 0x2a3   :  { %v764_v24 = vsel %vm763_vm10, %v760_v62, %v762_v19  ;;  %v767_v26 = vsel %vm763_vm10, %v762_v19, %v756_v54  ;;  %v800_v25 = vpop.permute.xlu0 %799 }
 0x2a4   :  { %v793_v0 = vmul.f32 %v782_v11, %v764_v24  ;;  %v794_v31 = vmul.f32 %v786_v12, %v767_v26  ;;  %882 = vmatprep.subr.bf16.mxu0 %v848_v23 }
 0x2a5   :  { %883 = vmatpush1.bf16.msra.mxu0 %v847_v22 }
 0x2a6   :  { %v849_v32 = vpack.c.bf16 %v793_v0, %v753_v29  ;;  %v798_v33 = vpop.permute.xlu1 %797  ;;  %v850_v34 = vpack.c.bf16 %v794_v31, %v754_v30 }
 0x2a7   :  { %v805_v38 = vsel %vm803_vm11, %v798_v33, %v800_v25  ;;  %v806_v40 = vsel %vm803_vm11, %v796_v16, %v798_v33 }
 0x2a8   :  { %v831_v41 = vmul.f32 %v814_v27, %v806_v40  ;;  %v832_v60 = vmul.f32 %v818_v28, %v805_v38  ;;  %923 = vmatprep.subr.bf16.mxu1 %v850_v34 }
 0x2a9   :  { %924 = vmatpush1.bf16.msra.mxu1 %v849_v32 }
 0x2aa   :  { %v851_v43 = vpack.c.bf16 %v831_v41, %v831_v41  ;;  %v852_v44 = vpack.c.bf16 %v832_v60, %v832_v60  ;;  %v802_v45 = vpop.permute.xlu1 %801 }
 0x2ab   :  { %v804_v49 = vsel %vm803_vm11, %v800_v25, %v802_v45  ;;  %v807_v54 = vsel %vm803_vm11, %v802_v45, %v796_v16 }
 0x2ac   :  { %v833_v55 = vmul.f32 %v822_v48, %v804_v49  ;;  %v834_v35 = vmul.f32 %v826_v42, %v807_v54  ;;  %1041 = vmatprep.subr.msk.bf16.mxu0 %vm199_vm1, %v852_v44  ;;  %v865_v15 = vsel %vm199_vm1, %v851_v43, 0 }
 0x2ad   :  { %885 = vmatpush1.bf16.msra.mxu0 %v865_v15 }
 0x2ae   :  { %v853_v1 = vpack.c.bf16 %v833_v55, %v833_v55  ;;  %v854_v37 = vpack.c.bf16 %v834_v35, %v834_v35 }
 0x2b0   :  { %1042 = vmatmul.mubr.msk.bf16.vlgmr.msra.gmra.mrb[16].mxu0 %vm860_vm12, %v855_v61  ;;  %1043 = vmatprep.subr.msk.bf16.mxu1 %vm199_vm1, %v854_v37  ;;  %v871_v46 = vsel %vm199_vm1, %v853_v1, 0 }
 0x2b1   :  { %926 = vmatpush1.bf16.msra.mxu1 %v871_v46 }
 0x2b4   :  { %1044 = vmatmul.mubr.msk.bf16.vlgmr.msra.gmra.mrb[16].mxu1 %vm860_vm12, %v855_v61  ;;  %v858_v62 = vpop.permute.xlu0 %857 }
 0x383   :  { %v910_v63 = vpop.f32.mrb[16].mxu0 }
 0x384   :  { %v911_v47 = vadd.f32 %v910_v63, %v858_v62  ;;  %v912_v2 = vpop.f32.mrb[17].mxu0 }
 0x385   :  { %v913_v36 = vadd.f32 %v912_v2, %v858_v62  ;;  %v914_v3 = vpop.f32.mrb[18].mxu0 }
 0x386   :  { %v1045_v39 = vmul.f32 -1.442695, %v911_v47  ;;  %v915_v5 = vpop.f32.mrb[19].mxu0 }
 0x387   :  { %v1046_v6 = vmul.f32 -1.442695, %v913_v36  ;;  %v951_v7 = vpop.f32.mrb[16].mxu1 }
 0x388   :  { %1072 = vpow2.f32 %v1045_v39  ;;  %v952_v8 = vadd.f32 %v951_v7, %v858_v62  ;;  %v953_v9 = vpop.f32.mrb[17].mxu1 }
 0x389   :  { %1074 = vpow2.f32 %v1046_v6  ;;  %v954_v10 = vadd.f32 %v953_v9, %v858_v62  ;;  %v955_v11 = vpop.f32.mrb[18].mxu1 }
 0x38a   :  { %v1047_v12 = vmul.f32 -1.442695, %v952_v8  ;;  %v956_v13 = vpop.f32.mrb[19].mxu1 }
 0x38b   :  { %v1048_v14 = vmul.f32 -1.442695, %v954_v10 }
 0x38c   :  { %1076 = vpow2.f32 %v1047_v12 }
 0x38d   :  { %1078 = vpow2.f32 %v1048_v14 }
 0x392   :  { %v1073_v16 = vpop.eup %1072 }
 0x393   :  { %v1075_v17 = vpop.eup %1074  ;;  %v970_v18 = vadd.f32 1.0, %v1073_v16 }
 0x394   :  { %v971_v20 = vadd.f32 1.0, %v1075_v17 }
 0x395   :  { %1080 = vrcp.f32 %v970_v18 }
 0x396   :  { %v1077_v4 = vpop.eup %1076  ;;  %1082 = vrcp.f32 %v971_v20 }
 0x397   :  { %v1079_v21 = vpop.eup %1078  ;;  %v972_v22 = vadd.f32 1.0, %v1077_v4 }
 0x398   :  { %v973_v19 = vadd.f32 1.0, %v1079_v21 }
 0x399   :  { %1084 = vrcp.f32 %v972_v22 }
 0x39a   :  { %1086 = vrcp.f32 %v973_v19 }
 0x39f   :  { %v1081_v23 = vpop.eup %1080 }
 0x3a0   :  { %v1083_v24 = vpop.eup %1082 }
 0x3a1   :  { %v982_v26 = vadd.f32 %v1083_v24, %v1081_v23 }
 0x3a3   :  { %v1085_v27 = vpop.eup %1084  ;;  %983 = vadd.xlane.f32.xlu1 %v982_v26 }
 0x3a4   :  { %v1087_v28 = vpop.eup %1086 }
 0x3a5   :  { %v996_v29 = vadd.f32 %v1087_v28, %v1085_v27 }
 0x3a7   :  { %997 = vadd.xlane.f32.xlu0 %v996_v29 }
 0x430   :  { %v984_v30 = vpop.xlane.xlu1 %983 }
 0x431   :  { %v986_v0 = vmul.f32 0.00390625, %v984_v30 }
 0x433   :  { %v987_v31 = vsub.f32 1.0, %v986_v0  ;;  %v990_v25 = vmul.f32 %v986_v0, %v1299_v52  ;;  %v991_v38 = vmul.f32 %v986_v0, %v1307_v58 }
 0x434   :  { %v998_v32 = vpop.xlane.xlu0 %997 }
 0x435   :  { %v988_v33 = vmul.f32 %v987_v31, %v1295_v50  ;;  %v989_v34 = vmul.f32 %v987_v31, %v1303_v56  ;;  %v999_v40 = vmul.f32 0.00390625, %v998_v32 }
 0x437   :  { %v992_v41 = vadd.f32 %v990_v25, %v988_v33  ;;  %v993_v60 = vadd.f32 %v991_v38, %v989_v34  ;;  %v1000_v48 = vsub.f32 1.0, %v999_v40  ;;  %v1003_v52 = vmul.f32 %v999_v40, %v1301_v53 }
 0x438   :  { %v1004_v50 = vmul.f32 %v999_v40, %v1309_v59 }
 0x439   :  { %994 = vst [vmem:[#allocation7] sm:$0xff] %v992_v41  ;;  %995 = vst [vmem:[#allocation7 + $0x8] sm:$0xff] %v993_v60  ;;  %v1001_v42 = vmul.f32 %v1000_v48, %v1297_v51  ;;  %v1002_v43 = vmul.f32 %v1000_v48, %v1305_v57 }
 0x43b   :  { %v1005_v44 = vadd.f32 %v1003_v52, %v1001_v42  ;;  %v1006_v56 = vadd.f32 %v1004_v50, %v1002_v43 }
 0x43d   :  { %1007 = vst [vmem:[#allocation7 + $0x10] sm:$0xff] %v1005_v44  ;;  %1008 = vst [vmem:[#allocation7 + $0x18] sm:$0xff] %v1006_v56 }
 0x43e   :  { %1143 = shalt.err (!%p1140_p6)
}
 0x43f   :  { %s1144_s13 = scalar_lea.hbm %s1544_s9, 512 }
 0x440   :  { %p1145_p7 = scmp.ne.s32.totalorder %s1544_s9, %s1144_s13  ;;  %p1148_p8 = scmp.lt.u32.totalorder %s1144_s13, %s1544_s9 }
 0x442   :  { %p1150_p9 = pnand %p1148_p8, %p1145_p7 }
 0x444   :  { %1153 = shalt.err (!%p1150_p9)
}
 0x445   :  { %1018 = dma.vmem_to_hbm [thread:$0]  %s1016_s30, 512, %s1544_s9, [#allocation4]  }
 0x446   :  { %1158 = dma.done.wait [#allocation4], 512  }
 0x447   :  { %1159 = vsyncadd [#allocation4], 4294966784 }
 0x448   :  { %1022 = vsyncpa [#allocation3], 1 }
 0x449   :  { %1023 = vsyncpa [#allocation6], 1 }
 0x44a   :  { %1024 = vsyncpa [#allocation4], 1 }

</bundles_post_ra>
